<compile_context>
chip_gen: v5e
topology: v5e:2x2
jax: 0.10.0
libtpu: 0.0.40
codegen_flags: <defaults>
</compile_context>

<pallas_src>
import jax
import jax.numpy as jnp
from jax.experimental import pallas as pl
from jax.experimental.pallas import tpu as pltpu


def _round_up(n, m):
    return ((n + m - 1) // m) * m


def mlp_kernel(x_ref, w1_ref, b1_ref, w2_ref, b2_ref, w3_ref, b3_ref, o_ref):
    # fc1 + ReLU (MXU)
    h1 = jnp.dot(x_ref[...], w1_ref[...], preferred_element_type=jnp.float32)
    h1 = jnp.maximum(h1 + b1_ref[...], 0.0)

    # fc2 + ReLU (MXU)
    h2 = jnp.dot(h1, w2_ref[...], preferred_element_type=jnp.float32)
    h2 = jnp.maximum(h2 + b2_ref[...], 0.0)

    # fc3 (N == 1): keep it off the MXU (an N=1 matmul wastes >=127/128 of the
    # array).  Transpose once (XLU slot, idle here), broadcast-multiply with
    # the (32, 1) weight column (VPU) and sublane-reduce -> a lane-dense
    # (1, batch_tile) row.
    h2t = h2.T                                                # (32, bt)
    h3 = jnp.sum(h2t * w3_ref[...], axis=0, keepdims=True)    # (1, bt)
    o_ref[...] = jax.nn.sigmoid(h3 + b3_ref[...]).astype(o_ref.dtype)


def mlp_forward(x, w1, b1, w2, b2, w3, b3, *, batch_tile=512):
    B, F_in = x.shape
    assert w1.shape[0] == F_in

    # Zero-pad the feature dim 63 -> 64 (aligned 256-byte rows). Padding x
    # with a zero column and w1 with a zero row leaves the math unchanged.
    F_pad = _round_up(F_in, 64)
    if F_pad != F_in:
        x = jnp.pad(x, ((0, 0), (0, F_pad - F_in)))
        w1 = jnp.pad(w1, ((0, F_pad - F_in), (0, 0)))

    # Batch tile: large by default (amortize per-step overhead, feed both
    # TensorCores on v7x at realistic batch sizes), clipped for tiny batches.
    bt = min(batch_tile, _round_up(B, 8))
    bt = _round_up(bt, 8)
    Bp = _round_up(B, bt)
    if Bp != B:
        x = jnp.pad(x, ((0, Bp - B), (0, 0)))

    grid = (Bp // bt,)

    full = lambda a: pl.BlockSpec(a.shape, lambda i: (0, 0))

    out = pl.pallas_call(
        mlp_kernel,
        out_shape=jax.ShapeDtypeStruct((1, Bp), jnp.float32),
        grid_spec=pltpu.PrefetchScalarGridSpec(
            num_scalar_prefetch=0,
            grid=grid,
            in_specs=[
                pl.BlockSpec((bt, F_pad), lambda i: (i, 0)),  # x: streamed
                full(w1), full(b1),                            # params: resident
                full(w2), full(b2),
                full(w3), full(b3),
            ],
            # Lane-dense output: (1, bt) blocks laid out along lanes.
            out_specs=pl.BlockSpec((1, bt), lambda i: (0, i)),
        ),
        compiler_params=pltpu.CompilerParams(
            dimension_semantics=("parallel",)),
    )(x, w1, b1, w2, b2, w3, b3)

    # Back to the module's (B, 1) output shape.
    return out[0, :B].reshape(B, 1)


def init_params(key):
    # Deterministic init mimicking nn.Linear's U(-1/sqrt(fan_in), 1/sqrt(fan_in)).
    def linear(key, fan_in, fan_out):
        kw, kb = jax.random.split(key)
        bound = 1.0 / jnp.sqrt(fan_in)
        # Stored as (in, out) so the kernel computes x @ W + b.
        w = jax.random.uniform(kw, (fan_in, fan_out), jnp.float32, -bound, bound)
        b = jax.random.uniform(kb, (1, fan_out), jnp.float32, -bound, bound)
        return w, b

    k1, k2, k3 = jax.random.split(key, 3)
    w1, b1 = linear(k1, 63, 96)
    w2, b2 = linear(k2, 96, 32)
    w3, b3 = linear(k3, 32, 1)
    return w1, b1, w2, b2, w3, b3


def reference_forward(x, w1, b1, w2, b2, w3, b3):
    h = jax.nn.relu(x @ w1 + b1)
    h = jax.nn.relu(h @ w2 + b2)
    return jax.nn.sigmoid(h @ w3 + b3)


if __name__ == "__main__":
    key = jax.random.PRNGKey(0)
    kx, kx2, kp = jax.random.split(key, 3)
    params = init_params(kp)

    # Small toy batch (input features fixed by the module at 63).
    B = 8
    x = jax.random.normal(kx, (B, 63), jnp.float32)
    out = jax.block_until_ready(mlp_forward(x, *params))
    ref = reference_forward(x, *params)
    assert out.shape == (B, 1)
    assert jnp.allclose(out, ref, atol=1e-5, rtol=1e-5)

    # Second check exercising the real tiled path (padding + grid > 1).
    B2 = 520
    x2 = jax.random.normal(kx2, (B2, 63), jnp.float32)
    out2 = jax.block_until_ready(mlp_forward(x2, *params))
    ref2 = reference_forward(x2, *params)
    assert out2.shape == (B2, 1)
    assert jnp.allclose(out2, ref2, atol=1e-5, rtol=1e-5)

    print("KERNEL_OK")
</pallas_src>

<mosaic_0001>
module attributes {stable_mosaic.version = 11 : i64} {
  func.func @mlp_kernel(%arg0: i32, %arg1: memref<8x64xf32, #tpu.memory_space<vmem>>, %arg2: memref<64x96xf32, #tpu.memory_space<vmem>>, %arg3: memref<1x96xf32, #tpu.memory_space<vmem>>, %arg4: memref<96x32xf32, #tpu.memory_space<vmem>>, %arg5: memref<1x32xf32, #tpu.memory_space<vmem>>, %arg6: memref<32x1xf32, #tpu.memory_space<vmem>>, %arg7: memref<1x1xf32, #tpu.memory_space<vmem>>, %arg8: memref<1x8xf32, #tpu.memory_space<vmem>>) attributes {dimension_semantics = [#tpu.dimension_semantics<parallel>], iteration_bounds = array<i64: 1>, scalar_prefetch = 0 : i64, scratch_operands = 0 : i64, tpu.core_type = #tpu.core_type<tc>, window_params = [{transform_indices = @transform_0, window_bounds = array<i64: 8, 64>}, {pipeline_mode = #tpu.pipeline_mode<synchronous>, transform_indices = @transform_1, window_bounds = array<i64: 64, 96>}, {pipeline_mode = #tpu.pipeline_mode<synchronous>, transform_indices = @transform_2, window_bounds = array<i64: 1, 96>}, {pipeline_mode = #tpu.pipeline_mode<synchronous>, transform_indices = @transform_3, window_bounds = array<i64: 96, 32>}, {pipeline_mode = #tpu.pipeline_mode<synchronous>, transform_indices = @transform_4, window_bounds = array<i64: 1, 32>}, {pipeline_mode = #tpu.pipeline_mode<synchronous>, transform_indices = @transform_5, window_bounds = array<i64: 32, 1>}, {pipeline_mode = #tpu.pipeline_mode<synchronous>, transform_indices = @transform_6, window_bounds = array<i64: 1, 1>}, {transform_indices = @transform_7, window_bounds = array<i64: 1, 8>}]} {
    %c0 = arith.constant 0 : index
    %c0_0 = arith.constant 0 : index
    %0 = vector.load %arg1[%c0, %c0_0] : memref<8x64xf32, #tpu.memory_space<vmem>>, vector<8x64xf32>
    %c0_1 = arith.constant 0 : index
    %c0_2 = arith.constant 0 : index
    %1 = vector.load %arg2[%c0_1, %c0_2] : memref<64x96xf32, #tpu.memory_space<vmem>>, vector<64x96xf32>
    %cst = arith.constant dense<0.000000e+00> : vector<8x96xf32>
    %2 = tpu.matmul %0, %1, %cst {dimension_numbers = #tpu.dot_dimension_numbers<[1], [0], [0], [1], [0, 0, 1, 1], [], []>} : vector<8x64xf32>, vector<64x96xf32>, vector<8x96xf32> -> vector<8x96xf32>
    %c0_3 = arith.constant 0 : index
    %c0_4 = arith.constant 0 : index
    %3 = vector.load %arg3[%c0_3, %c0_4] : memref<1x96xf32, #tpu.memory_space<vmem>>, vector<1x96xf32>
    %4 = vector.broadcast %3 : vector<1x96xf32> to vector<8x96xf32>
    %5 = arith.addf %2, %4 : vector<8x96xf32>
    %cst_5 = arith.constant 0.000000e+00 : f32
    %6 = vector.broadcast %cst_5 : f32 to vector<8x96xf32>
    %7 = arith.maximumf %5, %6 : vector<8x96xf32>
    %c0_6 = arith.constant 0 : index
    %c0_7 = arith.constant 0 : index
    %8 = vector.load %arg4[%c0_6, %c0_7] : memref<96x32xf32, #tpu.memory_space<vmem>>, vector<96x32xf32>
    %cst_8 = arith.constant dense<0.000000e+00> : vector<8x32xf32>
    %9 = tpu.matmul %7, %8, %cst_8 {dimension_numbers = #tpu.dot_dimension_numbers<[1], [0], [0], [1], [0, 0, 1, 1], [], []>} : vector<8x96xf32>, vector<96x32xf32>, vector<8x32xf32> -> vector<8x32xf32>
    %c0_9 = arith.constant 0 : index
    %c0_10 = arith.constant 0 : index
    %10 = vector.load %arg5[%c0_9, %c0_10] : memref<1x32xf32, #tpu.memory_space<vmem>>, vector<1x32xf32>
    %11 = vector.broadcast %10 : vector<1x32xf32> to vector<8x32xf32>
    %12 = arith.addf %9, %11 : vector<8x32xf32>
    %cst_11 = arith.constant 0.000000e+00 : f32
    %13 = vector.broadcast %cst_11 : f32 to vector<8x32xf32>
    %14 = arith.maximumf %12, %13 : vector<8x32xf32>
    %15 = tpu.transpose %14, [1, 0] : vector<8x32xf32> -> vector<32x8xf32>
    %c0_12 = arith.constant 0 : index
    %c0_13 = arith.constant 0 : index
    %16 = vector.load %arg6[%c0_12, %c0_13] : memref<32x1xf32, #tpu.memory_space<vmem>>, vector<32x1xf32>
    %17 = vector.broadcast %16 : vector<32x1xf32> to vector<32x8xf32>
    %18 = arith.mulf %15, %17 : vector<32x8xf32>
    %cst_14 = arith.constant dense<0.000000e+00> : vector<8xf32>
    %19 = vector.multi_reduction <add>, %18, %cst_14 [0] : vector<32x8xf32> to vector<8xf32>
    %20 = vector.shape_cast %19 : vector<8xf32> to vector<1x8xf32>
    %c0_15 = arith.constant 0 : index
    %c0_16 = arith.constant 0 : index
    %21 = vector.load %arg7[%c0_15, %c0_16] : memref<1x1xf32, #tpu.memory_space<vmem>>, vector<1x1xf32>
    %22 = vector.broadcast %21 : vector<1x1xf32> to vector<1x8xf32>
    %23 = arith.addf %20, %22 : vector<1x8xf32>
    %24 = arith.negf %23 : vector<1x8xf32>
    %25 = math.exp %24 : vector<1x8xf32>
    %cst_17 = arith.constant 1.000000e+00 : f32
    %26 = vector.broadcast %cst_17 : f32 to vector<1x8xf32>
    %27 = arith.addf %26, %25 : vector<1x8xf32>
    %28 = arith.divf %26, %27 : vector<1x8xf32>
    %c0_18 = arith.constant 0 : index
    %c0_19 = arith.constant 0 : index
    %29 = vector.load %arg8[%c0_18, %c0_19] : memref<1x8xf32, #tpu.memory_space<vmem>>, vector<1x8xf32>
    tpu.vector_store %arg8[%c0_18, %c0_19], %28 {strides = array<i32>} : memref<1x8xf32, #tpu.memory_space<vmem>>, vector<1x8xf32>,
    return
  }
  func.func @transform_0(%arg0: i32) -> (i32, i32) {
    %c0_i32 = arith.constant 0 : i32
    %c0_i32_0 = arith.constant 0 : i32
    return %arg0, %c0_i32 : i32, i32
  }
  func.func @transform_1(%arg0: i32) -> (i32, i32) {
    %c0_i32 = arith.constant 0 : i32
    %c0_i32_0 = arith.constant 0 : i32
    %c0_i32_1 = arith.constant 0 : i32
    return %c0_i32, %c0_i32_0 : i32, i32
  }
  func.func @transform_2(%arg0: i32) -> (i32, i32) {
    %c0_i32 = arith.constant 0 : i32
    %c0_i32_0 = arith.constant 0 : i32
    %c0_i32_1 = arith.constant 0 : i32
    return %c0_i32, %c0_i32_0 : i32, i32
  }
  func.func @transform_3(%arg0: i32) -> (i32, i32) {
    %c0_i32 = arith.constant 0 : i32
    %c0_i32_0 = arith.constant 0 : i32
    %c0_i32_1 = arith.constant 0 : i32
    return %c0_i32, %c0_i32_0 : i32, i32
  }
  func.func @transform_4(%arg0: i32) -> (i32, i32) {
    %c0_i32 = arith.constant 0 : i32
    %c0_i32_0 = arith.constant 0 : i32
    %c0_i32_1 = arith.constant 0 : i32
    return %c0_i32, %c0_i32_0 : i32, i32
  }
  func.func @transform_5(%arg0: i32) -> (i32, i32) {
    %c0_i32 = arith.constant 0 : i32
    %c0_i32_0 = arith.constant 0 : i32
    %c0_i32_1 = arith.constant 0 : i32
    return %c0_i32, %c0_i32_0 : i32, i32
  }
  func.func @transform_6(%arg0: i32) -> (i32, i32) {
    %c0_i32 = arith.constant 0 : i32
    %c0_i32_0 = arith.constant 0 : i32
    %c0_i32_1 = arith.constant 0 : i32
    return %c0_i32, %c0_i32_0 : i32, i32
  }
  func.func @transform_7(%arg0: i32) -> (i32, i32) {
    %c0_i32 = arith.constant 0 : i32
    %c0_i32_0 = arith.constant 0 : i32
    return %c0_i32, %arg0 : i32, i32
  }
}

</mosaic_0001>

<bundles_post_ra>
// kernel: tpu_custom_call.1
= control target key start
LH: loop header
LB: loop body
LE: loop exit
PB: predicated region body
PF: predicated region fallthrough
CT: control target
= control target key end

     0   :  { %s397_s0 = inlined_call_operand.vmem [shape: f32[8,64], index: 0, kind: input, shape index: {}]   ;;  %s398_s1 = inlined_call_operand.vmem [shape: f32[64,96], index: 1, kind: input, shape index: {}]   ;;  %s399_s2 = inlined_call_operand.vmem [shape: f32[1,96], index: 2, kind: input, shape index: {}]   ;;  %s400_s3 = inlined_call_operand.vmem [shape: f32[96,32], index: 3, kind: input, shape index: {}]   ;;  %s401_s4 = inlined_call_operand.vmem [shape: f32[1,32], index: 4, kind: input, shape index: {}]   ;;  %s402_s5 = inlined_call_operand.vmem [shape: f32[32,1], index: 5, kind: input, shape index: {}]   ;;  %s403_s6 = inlined_call_operand.<no memory space> [shape: f32[1,1], index: 6, kind: input, shape index: {}]   ;;  %s404_s7 = inlined_call_operand.hbm [shape: f32[1,8], index: 7, kind: output, shape index: {}]  }
   0x1   :  { %v12_v0 = vstv %s403_s6 }
   0x2   :  { %13 = vst [vmem:[#allocation2] sm:$0x1] %v12_v0 }
   0x3   :  { %v37_v1 = vld [vmem:[%s398_s1 + $0x38] sm:$0xff]  ;;  %v36_v2 = vld [vmem:[%s398_s1 + $0x30] sm:$0xff]  ;;  %v35_v3 = vld [vmem:[%s398_s1 + $0x28] sm:$0xff] }
   0x4   :  { %54 = vmatpush.msra.mxu0 %v37_v1  ;;  %v78_v4 = vld [vmem:[%s400_s3 + $0x58] sm:$0xff]  ;;  %v77_v5 = vld [vmem:[%s400_s3 + $0x50] sm:$0xff]  ;;  %v34_v6 = vld [vmem:[%s398_s1 + $0x20] sm:$0xff] }
   0x5   :  { %91 = vmatpush.msra.mxu1 %v78_v4  ;;  %v76_v7 = vld [vmem:[%s400_s3 + $0x48] sm:$0xff]  ;;  %v33_v8 = vld [vmem:[%s398_s1 + $0x18] sm:$0xff]  ;;  %v75_v9 = vld [vmem:[%s400_s3 + $0x40] sm:$0xff] }
   0x6   :  { %55 = vmatpush.msra.mxu0 %v36_v2 }
   0x7   :  { %92 = vmatpush.msra.mxu1 %v77_v5 }
   0x8   :  { %56 = vmatpush.msra.mxu0 %v35_v3 }
   0xa   :  { %57 = vmatpush.msra.mxu0 %v34_v6 }
   0xb   :  { %14 = vsyncpa [#allocation4], 0  ;;  %v32_v10 = vld [vmem:[%s398_s1 + $0x10] sm:$0xff]  ;;  %93 = vmatpush.msra.mxu1 %v76_v7  ;;  %v74_v11 = vld [vmem:[%s400_s3 + $0x38] sm:$0xff]  ;;  %vm42_vm0 = vcmask 523264   ;;  %vm83_vm1 = vcmask 785408  }
   0xc   :  { %58 = vmatpush.msra.mxu0 %v33_v8  ;;  %v31_v12 = vld [vmem:[%s398_s1 + $0x8] sm:$0xff]  ;;  %v73_v13 = vld [vmem:[%s400_s3 + $0x30] sm:$0xff]  ;;  %v30_v14 = vld [vmem:[%s398_s1] sm:$0xff]  ;;  %v268_v28 = vmov 0   ;;  %vm168_vm2 = vcmask 64512   ;;  %s218_s30 = sshll.u32 %s404_s7, 4  ;;  %s219_s30 = int_to_ptr.hbm [resolvable:$true] %s218_s30 }
   0xd   :  { %94 = vmatpush.msra.mxu1 %v75_v9  ;;  %v29_v15 = vld [vmem:[%s397_s0] sm:$0xff]  ;;  %v72_v16 = vld [vmem:[%s400_s3 + $0x28] sm:$0xff]  ;;  %v70_v18 = vld [vmem:[%s400_s3 + $0x18] sm:$0xff]  ;;  %233 = vset.pattern.permute.xlu0 %v268_v28  ;;  %vm209_vm6 = vcmask 57344  }
   0xe   :  { %59 = vmatpush.msra.mxu0 %v32_v10  ;;  %v71_v17 = vld [vmem:[%s400_s3 + $0x20] sm:$0xff]  ;;  %v69_v19 = vld [vmem:[%s400_s3 + $0x10] sm:$0xff]  ;;  %v68_v20 = vld [vmem:[%s400_s3 + $0x8] sm:$0xff]  ;;  %234 = vset.pattern.permute.xlu1 %v268_v28 }
   0xf   :  { %95 = vmatpush.msra.mxu1 %v74_v11  ;;  %v67_v21 = vld [vmem:[%s400_s3] sm:$0xff]  ;;  %v142_v27 = vld [vmem:[%s402_s5 + $0x10] sm:$0xff]  ;;  %v141_v29 = vld [vmem:[%s402_s5 + $0x8] sm:$0xff] }
  0x10   :  { %60 = vmatpush.msra.mxu0 %v31_v12  ;;  %v236_v22 = vld [vmem:[%s399_s2] ss:$0 sm:$0xff]  ;;  %156 = vperm.xlu1 %234, %v142_v27   ;;  %v143_v30 = vld [vmem:[%s402_s5 + $0x18] sm:$0xff] }
  0x11   :  { %96 = vmatpush.msra.mxu1 %v73_v13  ;;  %v140_v26 = vld [vmem:[%s402_s5] sm:$0xff] }
  0x12   :  { %61 = vmatpush.msra.mxu0 %v30_v14  ;;  %146 = vperm.xlu0 %233, %v140_v26   ;;  %v237_v31 = vld [vmem:[%s401_s4] ss:$0 sm:$0xff]  ;;  %s269_s4 = smov [#allocation3]  }
  0x13   :  { %227 = vmatmul.msk.f32.vlgmr.msra.gmra.mxu0 %vm42_vm0, %v29_v15  ;;  %97 = vmatpush.msra.mxu1 %v72_v16  ;;  %v182_v35 = vld [vmem:[#allocation2] sm:$0x1]  ;;  %s216_s5 = sshll.u32 %s269_s4, 4  ;;  %s217_s5 = int_to_ptr.vmem [resolvable:$true] %s216_s5 }
  0x15   :  { %98 = vmatpush.msra.mxu1 %v71_v17 }
  0x17   :  { %99 = vmatpush.msra.mxu1 %v70_v18 }
  0x18   :  { %161 = vperm.xlu1 %234, %v143_v30  }
  0x19   :  { %100 = vmatpush.msra.mxu1 %v69_v19 }
  0x1a   :  { %151 = vperm.xlu0 %233, %v141_v29  }
  0x1b   :  { %101 = vmatpush.msra.mxu1 %v68_v20 }
  0x1d   :  { %102 = vmatpush.msra.mxu1 %v67_v21 }
  0x82   :  { %v157_v39 = vpop.permute.xlu1 %156 }
  0x84   :  { %v147_v38 = vpop.permute.xlu0 %146 }
  0x8a   :  { %v162_v47 = vpop.permute.xlu1 %161 }
  0x8c   :  { %v152_v41 = vpop.permute.xlu0 %151 }
  0x90   :  { %v63_v23 = vpop.f32.mrf.mxu0 }
  0x91   :  { %v64_v24 = vadd.f32 %v236_v22, %v63_v23 }
  0x93   :  { %v66_v25 = vmax.f32 %v64_v24, 0.0 }
  0x95   :  { %228 = vmatmul.msk.f32.vlgmr.msra.gmra.mxu1 %vm83_vm1, %v66_v25 }
 0x112   :  { %v104_v32 = vpop.f32.mrf.mxu1 }
 0x113   :  { %v105_v33 = vadd.f32 %v237_v31, %v104_v32 }
 0x115   :  { %v107_v34 = vmax.f32 %v105_v33, 0.0 }
 0x117   :  { %108 = vxpose.xlu2.b32.start.end [1/1] (short) (narrow) %v107_v34, 32 }
 0x179   :  { %235 = vset.pattern.permute.xlu2 %v268_v28 }
 0x198   :  { %185 = vperm.xlu2 %235, %v182_v35  }
 0x1b0   :  { %v124_v36 = vpop.trf.xlu2 }
 0x1b1   :  { %v164_v42 = vmul.f32 %v147_v38, %v124_v36 }
 0x1b3   :  { %v169_v44 = vsel %vm168_vm2, %v164_v42, 0.0 }
 0x1b8   :  { %v125_v37 = vpop.trf.xlu2 }
 0x1b9   :  { %v165_v43 = vmul.f32 %v152_v41, %v125_v37 }
 0x1bb   :  { %v170_v46 = vsel %vm168_vm2, %v165_v43, 0.0 }
 0x1bc   :  { %v171_v49 = vadd.f32 %v170_v46, %v169_v44 }
 0x1c0   :  { %v126_v40 = vpop.trf.xlu2 }
 0x1c1   :  { %v166_v45 = vmul.f32 %v157_v39, %v126_v40 }
 0x1c3   :  { %v172_v50 = vsel %vm168_vm2, %v166_v45, 0.0 }
 0x1c4   :  { %v173_v52 = vadd.f32 %v172_v50, %v171_v49 }
 0x1c8   :  { %v127_v48 = vpop.trf.xlu2 }
 0x1c9   :  { %v167_v51 = vmul.f32 %v162_v47, %v127_v48 }
 0x1cb   :  { %v174_v53 = vsel %vm168_vm2, %v167_v51, 0.0 }
 0x1cc   :  { %v175_v54 = vadd.f32 %v174_v53, %v173_v52 }
 0x1ce   :  { %v176_v55 = vrot.slane %v175_v54, 4 }
 0x1d0   :  { %v177_v56 = vadd.f32 %v176_v55, %v175_v54 }
 0x1d2   :  { %v178_v57 = vrot.slane %v177_v56, 2 }
 0x1d4   :  { %v179_v58 = vadd.f32 %v178_v57, %v177_v56 }
 0x1d6   :  { %v180_v59 = vrot.slane %v179_v58, 1 }
 0x1d8   :  { %v181_v61 = vadd.f32 %v180_v59, %v179_v58 }
 0x1f2   :  { %v186_v60 = vpop.permute.xlu2 %185 }
 0x1f3   :  { %v188_v62 = vperm.slane %v186_v60, 0 }
 0x1f5   :  { %v189_v63 = vadd.f32 %v188_v62, %v181_v61 }
 0x1f7   :  { %v229_v0 = vmul.f32 -1.442695, %v189_v63 }
 0x1f9   :  { %238 = vpow2.f32 %v229_v0 }
 0x1ff   :  { %v239_v1 = vpop.eup %238 }
 0x200   :  { %v193_v2 = vadd.f32 1.0, %v239_v1 }
 0x202   :  { %240 = vrcp.f32 %v193_v2  ;;  %v205_v6 = vand.u32 2147483648, %v193_v2  ;;  %v203_v8 = vand.u32 2147483647, %v193_v2  ;;  %vm199_vm4 = vweird.f32 %v193_v2 }
 0x204   :  { %v206_v10 = vor.u32 1.1754944e-38, %v205_v6  ;;  %vm204_vm7 = vcmp.eq.f32.partialorder %v203_v8, 8.507059e+37 }
 0x208   :  { %v241_v3 = vpop.eup %240 }
 0x209   :  { %v195_v4 = vmul.f32 %v241_v3, %v193_v2  ;;  %vm200_vm3 = vweird.f32 %v241_v3 }
 0x20a   :  { %vm201_vm5 = vmor %vm199_vm4, %vm200_vm3 }
 0x20b   :  { %v196_v5 = vsub.f32 1.0, %v195_v4 }
 0x20d   :  { %v197_v7 = vmul.f32 %v241_v3, %v196_v5 }
 0x20f   :  { %v198_v9 = vadd.f32 %v241_v3, %v197_v7 }
 0x211   :  { %v202_v11 = vsel %vm201_vm5, %v241_v3, %v198_v9 }
 0x212   :  { %v207_v12 = vsel %vm204_vm7, %v206_v10, %v202_v11 }
 0x213   :  { %210 = vst.msk [vmem:[#allocation3] sm:$0x1] %vm209_vm6, %v207_v12 }
 0x214   :  { %221 = dma.vmem_to_hbm [thread:$0]  %s217_s5, 16, %s219_s30, [#allocation4]  }
 0x215   :  { %266 = dma.done.wait [#allocation4], 16  }
 0x216   :  { %267 = vsyncadd [#allocation4], 4294967280 }
 0x217   :  { %226 = vsyncpa [#allocation4], 1 }

</bundles_post_ra>
